<compile_context>
chip_gen: v7x
topology: tpu7x:2x2x1
jax: 0.10.0
libtpu: 0.0.40
codegen_flags: <defaults>
</compile_context>

<pallas_src>
import jax
import jax.numpy as jnp
import numpy as np
from jax.experimental import pallas as pl
from jax.experimental.pallas import tpu as pltpu

H1, H2, H3 = 128, 64, 32


def _mlp_kernel(x_ref,
                w1_ref, b1_ref,
                w2_ref, b2_ref,
                w3_ref, b3_ref,
                w4_ref, b4_ref,
                out_ref):
    """Fused 4-layer MLP on one [TM, F] batch tile. Weights are VMEM-resident."""
    # Layers 1-3: bf16 MXU matmuls with f32 accumulation; bias/ReLU in f32.
    h = jnp.dot(x_ref[...], w1_ref[...], preferred_element_type=jnp.float32)
    h = jnp.maximum(h + b1_ref[...], 0.0)

    h = jnp.dot(h.astype(jnp.bfloat16), w2_ref[...],
                preferred_element_type=jnp.float32)
    h = jnp.maximum(h + b2_ref[...], 0.0)

    h = jnp.dot(h.astype(jnp.bfloat16), w3_ref[...],
                preferred_element_type=jnp.float32)
    h = jnp.maximum(h + b3_ref[...], 0.0)

    # Layer 4 (N=1): an MXU matmul would use 1/256 of the output width; do it
    # on the VPU/XLU instead: broadcast-multiply by the [1, 32] weight row and
    # reduce over lanes.
    h4 = jnp.sum(h * w4_ref[...], axis=-1, keepdims=True) + b4_ref[...]
    out_ref[...] = jnp.tanh(h4)


def _choose_tile(batch, max_tile=1024):
    """Batch tile: large (amortizes ~0.35 us/step grid overhead, feeds the MXU
    M dimension) but never bigger than the (8-rounded) batch itself."""
    if batch >= max_tile:
        return max_tile
    return max(8, -(-batch // 8) * 8)


def prepare_params(params):
    """One-time conversion from PyTorch layout (W: [out,in], b: [out]) to the
    kernel layout: W -> [in,out] bf16 (MXU path), final layer as f32 [1,32]
    row (VPU path), biases as broadcastable f32 [1,out] rows."""
    w1 = params["w1"].T.astype(jnp.bfloat16)            # [F, 128]
    w2 = params["w2"].T.astype(jnp.bfloat16)            # [128, 64]
    w3 = params["w3"].T.astype(jnp.bfloat16)            # [64, 32]
    w4 = params["w4"].reshape(1, -1).astype(jnp.float32)  # [1, 32]
    b1 = params["b1"].reshape(1, -1).astype(jnp.float32)
    b2 = params["b2"].reshape(1, -1).astype(jnp.float32)
    b3 = params["b3"].reshape(1, -1).astype(jnp.float32)
    b4 = params["b4"].reshape(1, -1).astype(jnp.float32)  # [1, 1]
    return (w1, b1, w2, b2, w3, b3, w4, b4)


def board_evaluator_forward(x, kparams, *, max_tile=1024):
    """x: [B, rows, cols] float. kparams: output of prepare_params()."""
    B = x.shape[0]
    F = x.shape[1] * x.shape[2]
    x_flat = x.reshape(B, F).astype(jnp.bfloat16)   # nn.Flatten() + bf16 MXU input

    tm = _choose_tile(B, max_tile)
    b_pad = pl.cdiv(B, tm) * tm
    if b_pad != B:
        x_flat = jnp.pad(x_flat, ((0, b_pad - B), (0, 0)))

    w1, b1, w2, b2, w3, b3, w4, b4 = kparams

    batch_map = lambda i: (i, 0)
    const_map = lambda i: (0, 0)   # weights/biases: same block every step (resident)

    out = pl.pallas_call(
        _mlp_kernel,
        out_shape=jax.ShapeDtypeStruct((b_pad, 1), jnp.float32),
        grid=(b_pad // tm,),
        in_specs=[
            pl.BlockSpec((tm, F), batch_map),     # x tile
            pl.BlockSpec((F, H1), const_map),     # w1
            pl.BlockSpec((1, H1), const_map),     # b1
            pl.BlockSpec((H1, H2), const_map),    # w2
            pl.BlockSpec((1, H2), const_map),     # b2
            pl.BlockSpec((H2, H3), const_map),    # w3
            pl.BlockSpec((1, H3), const_map),     # b3
            pl.BlockSpec((1, H3), const_map),     # w4 row (VPU layer)
            pl.BlockSpec((1, 1), const_map),      # b4
        ],
        # TODO(synk): output is lane-width 1 ([TM,1] -> masked vst); total write
        # volume is only 4 B/sample so left as-is per review priority.
        out_specs=pl.BlockSpec((tm, 1), batch_map),
        compiler_params=pltpu.CompilerParams(
            dimension_semantics=("parallel",)),
    )(x_flat, w1, b1, w2, b2, w3, b3, w4, b4)

    return out[:B]


def init_params(rows, cols, key):
    """PyTorch-default-style init: U(-1/sqrt(fan_in), 1/sqrt(fan_in)), f32,
    stored PyTorch-style (W: [out, in], b: [out])."""
    sizes = [(128, rows * cols), (64, 128), (32, 64), (1, 32)]
    params = {}
    for i, (out_f, in_f) in enumerate(sizes, start=1):
        key, kw, kb = jax.random.split(key, 3)
        bound = 1.0 / np.sqrt(in_f)
        params[f"w{i}"] = jax.random.uniform(
            kw, (out_f, in_f), jnp.float32, minval=-bound, maxval=bound)
        params[f"b{i}"] = jax.random.uniform(
            kb, (out_f,), jnp.float32, minval=-bound, maxval=bound)
    return params


def _reference_forward(x, params):
    """Pure-JAX f32 reference mirroring the PyTorch module."""
    h = x.reshape(x.shape[0], -1)
    h = jnp.maximum(h @ params["w1"].T + params["b1"], 0.0)
    h = jnp.maximum(h @ params["w2"].T + params["b2"], 0.0)
    h = jnp.maximum(h @ params["w3"].T + params["b3"], 0.0)
    return jnp.tanh(h @ params["w4"].T + params["b4"])


if __name__ == "__main__":
    rows, cols, batch = 6, 7, 2   # connect-4 style board

    key = jax.random.PRNGKey(0)
    key, kx = jax.random.split(key)
    x = jax.random.normal(kx, (batch, rows, cols), jnp.float32)

    params = init_params(rows, cols, key)
    kparams = prepare_params(params)   # one-time layout/dtype conversion

    out = board_evaluator_forward(x, kparams)
    out = jax.block_until_ready(out)

    ref = _reference_forward(x, params)
    # Tolerance relaxed for bf16 MXU operands (f32 accumulation kept).
    np.testing.assert_allclose(np.asarray(out), np.asarray(ref),
                               rtol=3e-2, atol=3e-2)

    print("KERNEL_OK")
</pallas_src>

<mosaic_0001>
module attributes {stable_mosaic.version = 11 : i64} {
  func.func @_mlp_kernel(%arg0: i32, %arg1: memref<8x42xbf16, #tpu.memory_space<vmem>>, %arg2: memref<42x128xbf16, #tpu.memory_space<vmem>>, %arg3: memref<1x128xf32, #tpu.memory_space<vmem>>, %arg4: memref<128x64xbf16, #tpu.memory_space<vmem>>, %arg5: memref<1x64xf32, #tpu.memory_space<vmem>>, %arg6: memref<64x32xbf16, #tpu.memory_space<vmem>>, %arg7: memref<1x32xf32, #tpu.memory_space<vmem>>, %arg8: memref<1x32xf32, #tpu.memory_space<vmem>>, %arg9: memref<1x1xf32, #tpu.memory_space<vmem>>, %arg10: memref<8x1xf32, #tpu.memory_space<vmem>>) attributes {dimension_semantics = [#tpu.dimension_semantics<parallel>], iteration_bounds = array<i64: 1>, scalar_prefetch = 0 : i64, scratch_operands = 0 : i64, tpu.core_type = #tpu.core_type<tc>, window_params = [{transform_indices = @transform_0, window_bounds = array<i64: 8, 42>}, {pipeline_mode = #tpu.pipeline_mode<synchronous>, transform_indices = @transform_1, window_bounds = array<i64: 42, 128>}, {pipeline_mode = #tpu.pipeline_mode<synchronous>, transform_indices = @transform_2, window_bounds = array<i64: 1, 128>}, {pipeline_mode = #tpu.pipeline_mode<synchronous>, transform_indices = @transform_3, window_bounds = array<i64: 128, 64>}, {pipeline_mode = #tpu.pipeline_mode<synchronous>, transform_indices = @transform_4, window_bounds = array<i64: 1, 64>}, {pipeline_mode = #tpu.pipeline_mode<synchronous>, transform_indices = @transform_5, window_bounds = array<i64: 64, 32>}, {pipeline_mode = #tpu.pipeline_mode<synchronous>, transform_indices = @transform_6, window_bounds = array<i64: 1, 32>}, {pipeline_mode = #tpu.pipeline_mode<synchronous>, transform_indices = @transform_7, window_bounds = array<i64: 1, 32>}, {pipeline_mode = #tpu.pipeline_mode<synchronous>, transform_indices = @transform_8, window_bounds = array<i64: 1, 1>}, {transform_indices = @transform_9, window_bounds = array<i64: 8, 1>}]} {
    %c0 = arith.constant 0 : index
    %c0_0 = arith.constant 0 : index
    %0 = vector.load %arg1[%c0, %c0_0] : memref<8x42xbf16, #tpu.memory_space<vmem>>, vector<8x42xbf16>
    %c0_1 = arith.constant 0 : index
    %c0_2 = arith.constant 0 : index
    %1 = vector.load %arg2[%c0_1, %c0_2] : memref<42x128xbf16, #tpu.memory_space<vmem>>, vector<42x128xbf16>
    %cst = arith.constant dense<0.000000e+00> : vector<8x128xf32>
    %2 = tpu.matmul %0, %1, %cst {dimension_numbers = #tpu.dot_dimension_numbers<[1], [0], [0], [1], [0, 0, 1, 1], [], []>} : vector<8x42xbf16>, vector<42x128xbf16>, vector<8x128xf32> -> vector<8x128xf32>
    %c0_3 = arith.constant 0 : index
    %c0_4 = arith.constant 0 : index
    %3 = vector.load %arg3[%c0_3, %c0_4] : memref<1x128xf32, #tpu.memory_space<vmem>>, vector<1x128xf32>
    %4 = vector.broadcast %3 : vector<1x128xf32> to vector<8x128xf32>
    %5 = arith.addf %2, %4 : vector<8x128xf32>
    %cst_5 = arith.constant 0.000000e+00 : f32
    %6 = vector.broadcast %cst_5 : f32 to vector<8x128xf32>
    %7 = arith.maximumf %5, %6 : vector<8x128xf32>
    %8 = arith.truncf %7 : vector<8x128xf32> to vector<8x128xbf16>
    %c0_6 = arith.constant 0 : index
    %c0_7 = arith.constant 0 : index
    %9 = vector.load %arg4[%c0_6, %c0_7] : memref<128x64xbf16, #tpu.memory_space<vmem>>, vector<128x64xbf16>
    %cst_8 = arith.constant dense<0.000000e+00> : vector<8x64xf32>
    %10 = tpu.matmul %8, %9, %cst_8 {dimension_numbers = #tpu.dot_dimension_numbers<[1], [0], [0], [1], [0, 0, 1, 1], [], []>} : vector<8x128xbf16>, vector<128x64xbf16>, vector<8x64xf32> -> vector<8x64xf32>
    %c0_9 = arith.constant 0 : index
    %c0_10 = arith.constant 0 : index
    %11 = vector.load %arg5[%c0_9, %c0_10] : memref<1x64xf32, #tpu.memory_space<vmem>>, vector<1x64xf32>
    %12 = vector.broadcast %11 : vector<1x64xf32> to vector<8x64xf32>
    %13 = arith.addf %10, %12 : vector<8x64xf32>
    %cst_11 = arith.constant 0.000000e+00 : f32
    %14 = vector.broadcast %cst_11 : f32 to vector<8x64xf32>
    %15 = arith.maximumf %13, %14 : vector<8x64xf32>
    %16 = arith.truncf %15 : vector<8x64xf32> to vector<8x64xbf16>
    %c0_12 = arith.constant 0 : index
    %c0_13 = arith.constant 0 : index
    %17 = vector.load %arg6[%c0_12, %c0_13] : memref<64x32xbf16, #tpu.memory_space<vmem>>, vector<64x32xbf16>
    %cst_14 = arith.constant dense<0.000000e+00> : vector<8x32xf32>
    %18 = tpu.matmul %16, %17, %cst_14 {dimension_numbers = #tpu.dot_dimension_numbers<[1], [0], [0], [1], [0, 0, 1, 1], [], []>} : vector<8x64xbf16>, vector<64x32xbf16>, vector<8x32xf32> -> vector<8x32xf32>
    %c0_15 = arith.constant 0 : index
    %c0_16 = arith.constant 0 : index
    %19 = vector.load %arg7[%c0_15, %c0_16] : memref<1x32xf32, #tpu.memory_space<vmem>>, vector<1x32xf32>
    %20 = vector.broadcast %19 : vector<1x32xf32> to vector<8x32xf32>
    %21 = arith.addf %18, %20 : vector<8x32xf32>
    %cst_17 = arith.constant 0.000000e+00 : f32
    %22 = vector.broadcast %cst_17 : f32 to vector<8x32xf32>
    %23 = arith.maximumf %21, %22 : vector<8x32xf32>
    %c0_18 = arith.constant 0 : index
    %c0_19 = arith.constant 0 : index
    %24 = vector.load %arg8[%c0_18, %c0_19] : memref<1x32xf32, #tpu.memory_space<vmem>>, vector<1x32xf32>
    %25 = vector.broadcast %24 : vector<1x32xf32> to vector<8x32xf32>
    %26 = arith.mulf %23, %25 : vector<8x32xf32>
    %cst_20 = arith.constant dense<0.000000e+00> : vector<8xf32>
    %27 = vector.multi_reduction <add>, %26, %cst_20 [1] : vector<8x32xf32> to vector<8xf32>
    %28 = vector.shape_cast %27 : vector<8xf32> to vector<8x1xf32>
    %c0_21 = arith.constant 0 : index
    %c0_22 = arith.constant 0 : index
    %29 = vector.load %arg9[%c0_21, %c0_22] : memref<1x1xf32, #tpu.memory_space<vmem>>, vector<1x1xf32>
    %30 = vector.broadcast %29 : vector<1x1xf32> to vector<8x1xf32>
    %31 = arith.addf %28, %30 : vector<8x1xf32>
    %32 = math.tanh %31 : vector<8x1xf32>
    %c0_23 = arith.constant 0 : index
    %c0_24 = arith.constant 0 : index
    %33 = vector.load %arg10[%c0_23, %c0_24] : memref<8x1xf32, #tpu.memory_space<vmem>>, vector<8x1xf32>
    tpu.vector_store %arg10[%c0_23, %c0_24], %32 {strides = array<i32>} : memref<8x1xf32, #tpu.memory_space<vmem>>, vector<8x1xf32>,
    return
  }
  func.func @transform_0(%arg0: i32) -> (i32, i32) {
    %c0_i32 = arith.constant 0 : i32
    %c0_i32_0 = arith.constant 0 : i32
    return %arg0, %c0_i32 : i32, i32
  }
  func.func @transform_1(%arg0: i32) -> (i32, i32) {
    %c0_i32 = arith.constant 0 : i32
    %c0_i32_0 = arith.constant 0 : i32
    %c0_i32_1 = arith.constant 0 : i32
    return %c0_i32, %c0_i32_0 : i32, i32
  }
  func.func @transform_2(%arg0: i32) -> (i32, i32) {
    %c0_i32 = arith.constant 0 : i32
    %c0_i32_0 = arith.constant 0 : i32
    %c0_i32_1 = arith.constant 0 : i32
    return %c0_i32, %c0_i32_0 : i32, i32
  }
  func.func @transform_3(%arg0: i32) -> (i32, i32) {
    %c0_i32 = arith.constant 0 : i32
    %c0_i32_0 = arith.constant 0 : i32
    %c0_i32_1 = arith.constant 0 : i32
    return %c0_i32, %c0_i32_0 : i32, i32
  }
  func.func @transform_4(%arg0: i32) -> (i32, i32) {
    %c0_i32 = arith.constant 0 : i32
    %c0_i32_0 = arith.constant 0 : i32
    %c0_i32_1 = arith.constant 0 : i32
    return %c0_i32, %c0_i32_0 : i32, i32
  }
  func.func @transform_5(%arg0: i32) -> (i32, i32) {
    %c0_i32 = arith.constant 0 : i32
    %c0_i32_0 = arith.constant 0 : i32
    %c0_i32_1 = arith.constant 0 : i32
    return %c0_i32, %c0_i32_0 : i32, i32
  }
  func.func @transform_6(%arg0: i32) -> (i32, i32) {
    %c0_i32 = arith.constant 0 : i32
    %c0_i32_0 = arith.constant 0 : i32
    %c0_i32_1 = arith.constant 0 : i32
    return %c0_i32, %c0_i32_0 : i32, i32
  }
  func.func @transform_7(%arg0: i32) -> (i32, i32) {
    %c0_i32 = arith.constant 0 : i32
    %c0_i32_0 = arith.constant 0 : i32
    %c0_i32_1 = arith.constant 0 : i32
    return %c0_i32, %c0_i32_0 : i32, i32
  }
  func.func @transform_8(%arg0: i32) -> (i32, i32) {
    %c0_i32 = arith.constant 0 : i32
    %c0_i32_0 = arith.constant 0 : i32
    %c0_i32_1 = arith.constant 0 : i32
    return %c0_i32, %c0_i32_0 : i32, i32
  }
  func.func @transform_9(%arg0: i32) -> (i32, i32) {
    %c0_i32 = arith.constant 0 : i32
    %c0_i32_0 = arith.constant 0 : i32
    return %arg0, %c0_i32 : i32, i32
  }
}

</mosaic_0001>

<bundles_post_ra>
// kernel: tpu_custom_call.1
= control target key start
LH: loop header
LB: loop body
LE: loop exit
PB: predicated region body
PF: predicated region fallthrough
CT: control target
= control target key end

     0   :  { %v441_v0 = vmov 0.0   ;;  %vm442_vm0 = vmmov 0   ;;  %vm70_vm1 = vcmask 1044480   ;;  %vm66_vm2 = vcmask 343040   ;;  %s580_s1 = inlined_call_operand.vmem [shape: bf16[42,128], index: 1, kind: input, shape index: {}]   ;;  %s581_s3 = inlined_call_operand.vmem [shape: bf16[128,64], index: 3, kind: input, shape index: {}]   ;;  %s582_s0 = inlined_call_operand.vmem [shape: bf16[8,42], index: 0, kind: input, shape index: {}]   ;;  %s583_s5 = inlined_call_operand.vmem [shape: bf16[64,32], index: 5, kind: input, shape index: {}]   ;;  %s584_s2 = inlined_call_operand.vmem [shape: f32[1,128], index: 2, kind: input, shape index: {}]   ;;  %s585_s4 = inlined_call_operand.vmem [shape: f32[1,64], index: 4, kind: input, shape index: {}]   ;;  %s586_s8 = inlined_call_operand.<no memory space> [shape: f32[1,1], index: 8, kind: input, shape index: {}]   ;;  %s587_s6 = inlined_call_operand.vmem [shape: f32[1,32], index: 6, kind: input, shape index: {}]   ;;  %s588_s7 = inlined_call_operand.vmem [shape: f32[1,32], index: 7, kind: input, shape index: {}]   ;;  %s589_s9 = inlined_call_operand.vmem [shape: f32[8,1], index: 9, kind: output, shape index: {}]  }
   0x1   :  { %380 = vmatprep.subr.bf16.mxu0 %v441_v0  ;;  %v424_v1 = vld [vmem:[%s580_s1] sm:$0xff]   ;;  %386 = vmatprep.mubr.msk.bf16.mxu0 %vm442_vm0, %v441_v0  ;;  %v425_v2 = vld [vmem:[%s580_s1 + $0x8] sm:$0xff]   ;;  %v426_v3 = vld [vmem:[%s580_s1 + $0x10] sm:$0x1f]   ;;  %vm268_vm3 = vcmask 523264   ;;  %v14_v34 = vstv %s586_s8  ;;  %vm321_vm4 = vcmask 261120  }
   0x2   :  { %390 = vmatprep.subr.bf16.mxu1 %v441_v0  ;;  %406 = vmatprep.mubr.msk.bf16.mxu1 %vm442_vm0, %v441_v0  ;;  %v427_v4 = vld [vmem:[%s581_s3] sm:$0xff]   ;;  %v428_v5 = vld [vmem:[%s581_s3 + $0x8] sm:$0xff]   ;;  %v72_v6 = vsel %vm70_vm1, %v426_v3, 0  ;;  %v429_v8 = vld [vmem:[%s581_s3 + $0x10] sm:$0xff]   ;;  %15 = vst [vmem:[#allocation2] sm:$0x1] %v14_v34 }
   0x3   :  { %381 = vmatpush3.bf16.msra.mxu0 %v424_v1  ;;  %391 = vmatpush3.bf16.msra.mxu1 %v427_v4  ;;  %v35_v7 = vld [vmem:[%s582_s0] sm:$0xf]  ;;  %v430_v9 = vld [vmem:[%s581_s3 + $0x18] sm:$0xff]   ;;  %v432_v11 = vld [vmem:[%s581_s3 + $0x28] sm:$0xff]   ;;  %vm334_vm5 = vcmask 7168  }
   0x4   :  { %382 = vmatprep.subr.bf16.mxu0 %v441_v0  ;;  %392 = vmatprep.subr.bf16.mxu1 %v441_v0  ;;  %v431_v10 = vld [vmem:[%s581_s3 + $0x20] sm:$0xff]   ;;  %v433_v12 = vld [vmem:[%s581_s3 + $0x30] sm:$0xff]   ;;  %v434_v13 = vld [vmem:[%s581_s3 + $0x38] sm:$0xff]  }
   0x5   :  { %v435_v14 = vld [vmem:[%s583_s5] sm:$0xff]   ;;  %v436_v15 = vld [vmem:[%s583_s5 + $0x8] sm:$0xff]   ;;  %v437_v24 = vld [vmem:[%s583_s5 + $0x10] sm:$0xff]  }
   0x6   :  { %v340_v16 = vld [vmem:[%s584_s2] ss:$0 sm:$0xff]  ;;  %v438_v25 = vld [vmem:[%s583_s5 + $0x18] sm:$0xff]  }
   0x7   :  { %383 = vmatpush3.bf16.msra.mxu0 %v425_v2  ;;  %393 = vmatpush3.bf16.msra.mxu1 %v428_v5  ;;  %v345_v26 = vld [vmem:[%s585_s4] ss:$0 sm:$0xff] }
   0x8   :  { %384 = vmatprep.subr.bf16.mxu0 %v441_v0  ;;  %394 = vmatprep.subr.bf16.mxu1 %v441_v0  ;;  %v354_v35 = vld [vmem:[%s587_s6] ss:$0 sm:$0xff] }
   0x9   :  { %v360_v40 = vld [vmem:[%s588_s7] ss:$0 sm:$0xff] }
   0xa   :  { %v361_v45 = vld [vmem:[#allocation2] ss:$0 sm:$0xff] }
   0xb   :  { %385 = vmatpush3.bf16.msra.mxu0 %v72_v6  ;;  %395 = vmatpush3.bf16.msra.mxu1 %v429_v8 }
   0xc   :  { %410 = vmatprep.subr.bf16.mxu0 %v441_v0  ;;  %396 = vmatprep.subr.bf16.mxu1 %v441_v0 }
   0xe   :  { %387 = vmatmul.mubr.msk.bf16.vlgmr.msra.gmra.mrb[0].mxu0 %vm66_vm2, %v35_v7 }
   0xf   :  { %418 = vmatprep.mubr.msk.bf16.mxu0 %vm442_vm0, %v441_v0  ;;  %397 = vmatpush3.bf16.msra.mxu1 %v430_v9 }
  0x10   :  { %398 = vmatprep.subr.bf16.mxu1 %v441_v0  ;;  %411 = vmatpush3.bf16.msra.mxu0 %v435_v14 }
  0x11   :  { %412 = vmatprep.subr.bf16.mxu0 %v441_v0 }
  0x13   :  { %399 = vmatpush3.bf16.msra.mxu1 %v431_v10 }
  0x14   :  { %400 = vmatprep.subr.bf16.mxu1 %v441_v0  ;;  %413 = vmatpush3.bf16.msra.mxu0 %v436_v15 }
  0x15   :  { %414 = vmatprep.subr.bf16.mxu0 %v441_v0 }
  0x17   :  { %401 = vmatpush3.bf16.msra.mxu1 %v432_v11 }
  0x18   :  { %402 = vmatprep.subr.bf16.mxu1 %v441_v0  ;;  %415 = vmatpush3.bf16.msra.mxu0 %v437_v24 }
  0x19   :  { %416 = vmatprep.subr.bf16.mxu0 %v441_v0 }
  0x1b   :  { %403 = vmatpush3.bf16.msra.mxu1 %v433_v12 }
  0x1c   :  { %404 = vmatprep.subr.bf16.mxu1 %v441_v0  ;;  %417 = vmatpush3.bf16.msra.mxu0 %v438_v25 }
  0x1f   :  { %405 = vmatpush3.bf16.msra.mxu1 %v434_v13 }
  0xe1   :  { %v108_v17 = vpop.f32.mrb[0].mxu0 }
  0xe2   :  { %v109_v18 = vadd.f32 %v340_v16, %v108_v17  ;;  %v388_v19 = vpop.f32.mrb[1].mxu0 }
  0xe3   :  { %v111_v20 = vpop.f32.mrb[2].mxu0 }
  0xe4   :  { %v114_v21 = vmax.f32 %v109_v18, 0.0  ;;  %v389_v22 = vpop.f32.mrb[3].mxu0 }
  0xe6   :  { %v115_v23 = vpack.c.bf16 %v114_v21, %v114_v21 }
  0xe8   :  { %407 = vmatmul.mubr.bf16.vlgmr.msra.gmra.mrb[0].mxu1 %v115_v23 }
 0x1bb   :  { %v221_v27 = vpop.f32.mrb[0].mxu1 }
 0x1bc   :  { %v222_v28 = vadd.f32 %v345_v26, %v221_v27  ;;  %v408_v29 = vpop.f32.mrb[1].mxu1 }
 0x1bd   :  { %v224_v30 = vpop.f32.mrb[2].mxu1 }
 0x1be   :  { %v227_v31 = vmax.f32 %v222_v28, 0.0  ;;  %v409_v32 = vpop.f32.mrb[3].mxu1 }
 0x1c0   :  { %v228_v33 = vpack.c.bf16 %v227_v31, %v227_v31 }
 0x1c2   :  { %419 = vmatmul.mubr.msk.bf16.vlgmr.msra.gmra.mrb[4].mxu0 %vm268_vm3, %v228_v33 }
 0x295   :  { %v306_v36 = vpop.f32.mrb[4].mxu0 }
 0x296   :  { %v307_v37 = vadd.f32 %v354_v35, %v306_v36  ;;  %v420_v38 = vpop.f32.mrb[5].mxu0 }
 0x297   :  { %v309_v39 = vpop.f32.mrb[6].mxu0 }
 0x298   :  { %v312_v41 = vmax.f32 %v307_v37, 0.0  ;;  %v421_v42 = vpop.f32.mrb[7].mxu0 }
 0x29a   :  { %v320_v43 = vmul.f32 %v360_v40, %v312_v41 }
 0x29c   :  { %v322_v44 = vsel %vm321_vm4, %v320_v43, 0.0 }
 0x29d   :  { %323 = vadd.xlane.f32.xlu0 %v322_v44 }
 0x32a   :  { %v324_v46 = vpop.xlane.xlu0 %323 }
 0x32b   :  { %v332_v47 = vadd.f32 %v361_v45, %v324_v46 }
 0x32d   :  { %439 = vtanh.f32 %v332_v47 }
 0x337   :  { %v440_v48 = vpop.eup %439 }
 0x338   :  { %335 = vst.msk [vmem:[%s589_s9] sm:$0xff] %vm334_vm5, %v440_v48 }

</bundles_post_ra>
